<compile_context>
chip_gen: v6e
topology: v6e:2x2x1
jax: 0.10.0
libtpu: 0.0.40
codegen_flags: <defaults>
</compile_context>

<pallas_src>
import math

import jax
import jax.numpy as jnp
from jax.experimental import pallas as pl
from jax.experimental.pallas import tpu as pltpu


def _round_up(v, m):
    return ((v + m - 1) // m) * m


# ----------------------------------------------------------------------------
# Fused kernel: all LSTM layers + FC head in one body.
# ----------------------------------------------------------------------------
def make_fused_kernel(num_layers, gate_width, k_pad):
    G = gate_width

    def kernel(x_ref, w_ref, b_ref, fc_w_ref, fc_b_ref, out_ref):
        # x_ref:    (bm, K_pad)    f32   batch tile, zero-padded input
        # w_ref:    (L, K_pad, 3G) bf16  packed gate weights, all layers
        # b_ref:    (L, 1, 3G)     f32   packed (b_ih + b_hh) biases
        # fc_w_ref: (G, C_pad)     bf16  classifier weight (lane-dense)
        # fc_b_ref: (1, C_pad)     f32
        # out_ref:  (bm, C_pad)    f32
        act = x_ref[...]                                      # (bm, K_pad) f32
        for l in range(num_layers):
            if l > 0 and k_pad > G:
                # Re-pad activation up to the uniform K_pad (static branch;
                # dead when K_pad == G, as in the demo config).
                act = jnp.concatenate(
                    [act, jnp.zeros((act.shape[0], k_pad - G), act.dtype)],
                    axis=1)
            gates = (
                jnp.dot(act.astype(jnp.bfloat16), w_ref[l],
                        preferred_element_type=jnp.float32)
                + b_ref[l]
            )                                                  # (bm, 3G) f32
            # Column layout per 128-aligned group:
            #   [i_fwd|i_bwd|pad] [g_fwd|g_bwd|pad] [o_fwd|o_bwd|pad]
            i_gate = jax.nn.sigmoid(gates[:, 0 * G:1 * G])
            g_gate = jnp.tanh(gates[:, 1 * G:2 * G])
            o_gate = jax.nn.sigmoid(gates[:, 2 * G:3 * G])
            # c0 == 0  =>  c = i * g ;  h = o * tanh(c).
            # Real lanes are already [h_fwd | h_bwd]; pad lanes are exactly 0.
            act = o_gate * jnp.tanh(i_gate * g_gate)           # (bm, G) f32

        out_ref[...] = (
            jnp.dot(act.astype(jnp.bfloat16), fc_w_ref[...],
                    preferred_element_type=jnp.float32)
            + fc_b_ref[...]
        )

    return kernel


# ----------------------------------------------------------------------------
# Wrapper: one pallas_call, batch grid axis (parallel), weights resident.
# ----------------------------------------------------------------------------
def bilstm_classifier_forward(params, x, hidden_size, num_classes):
    del hidden_size  # all sizes are carried by the packed parameter shapes
    B, input_size = x.shape
    w_all = params["w_all"]                    # (L, K_pad, 3G) bf16
    b_all = params["b_all"]                    # (L, 1, 3G)     f32
    fc_w = params["fc_w"]                      # (G, C_pad)     bf16
    fc_b = params["fc_b"]                      # (1, C_pad)     f32
    num_layers, k_pad, three_g = w_all.shape
    G = three_g // 3
    c_pad = fc_w.shape[1]

    # Batch tiling: >=8 sublanes; 256-row blocks for large batches (MXU rows).
    bm = 256 if B >= 256 else _round_up(max(B, 1), 8)
    b_pad = _round_up(B, bm)

    x_pad = jnp.zeros((b_pad, k_pad), jnp.float32).at[:B, :input_size].set(
        x.astype(jnp.float32))

    out_padded = pl.pallas_call(
        make_fused_kernel(num_layers, G, k_pad),
        out_shape=jax.ShapeDtypeStruct((b_pad, c_pad), jnp.float32),
        grid=(b_pad // bm,),
        in_specs=[
            pl.BlockSpec((bm, k_pad), lambda i: (i, 0)),
            pl.BlockSpec((num_layers, k_pad, three_g), lambda i: (0, 0, 0)),
            pl.BlockSpec((num_layers, 1, three_g), lambda i: (0, 0, 0)),
            pl.BlockSpec((G, c_pad), lambda i: (0, 0)),
            pl.BlockSpec((1, c_pad), lambda i: (0, 0)),
        ],
        out_specs=pl.BlockSpec((bm, c_pad), lambda i: (i, 0)),
        compiler_params=pltpu.CompilerParams(
            dimension_semantics=("parallel",)),
    )(x_pad, w_all, b_all, fc_w, fc_b)
    return out_padded[:B, :num_classes]


# ----------------------------------------------------------------------------
# Parameter construction (mirrors nn.LSTM / nn.Linear shapes & init), plus the
# 128-lane-aligned repacking used by the fused kernel.
# ----------------------------------------------------------------------------
def init_params(key, input_size, hidden_size, num_layers, num_classes):
    H = hidden_size
    stdv = 1.0 / math.sqrt(H)

    torch_layers = []
    for layer in range(num_layers):
        layer_in = input_size if layer == 0 else 2 * H
        dirs = []
        for _ in range(2):  # forward, backward
            key, k1, k2, k3, k4 = jax.random.split(key, 5)
            w_ih = jax.random.uniform(k1, (4 * H, layer_in), jnp.float32, -stdv, stdv)
            w_hh = jax.random.uniform(k2, (4 * H, H), jnp.float32, -stdv, stdv)
            b_ih = jax.random.uniform(k3, (4 * H,), jnp.float32, -stdv, stdv)
            b_hh = jax.random.uniform(k4, (4 * H,), jnp.float32, -stdv, stdv)
            # w_hh is irrelevant here (h0 == 0) but drawn for PyTorch parity.
            dirs.append({"w_ih": w_ih, "w_hh": w_hh, "b_ih": b_ih, "b_hh": b_hh})
        torch_layers.append(dirs)

    key, kf1, kf2 = jax.random.split(key, 3)
    fc_stdv = 1.0 / math.sqrt(2 * H)
    fc_w = jax.random.uniform(kf1, (num_classes, 2 * H), jnp.float32, -fc_stdv, fc_stdv)
    fc_b = jax.random.uniform(kf2, (num_classes,), jnp.float32, -fc_stdv, fc_stdv)

    # ---- repack for the fused kernel (128-lane-aligned gate groups) ------
    G = _round_up(2 * H, 128)                          # gate-group / act width
    k_pad = _round_up(max(input_size, 2 * H), 128)     # uniform matmul K
    c_pad = _round_up(num_classes, 128)                # lane-dense output

    w_all = jnp.zeros((num_layers, k_pad, 3 * G), jnp.float32)
    b_all = jnp.zeros((num_layers, 1, 3 * G), jnp.float32)
    for l, dirs in enumerate(torch_layers):
        layer_in = input_size if l == 0 else 2 * H
        for gi, gate in enumerate((0, 2, 3)):          # i, g, o (PyTorch [i,f,g,o])
            for di, d in enumerate(dirs):              # fwd, bwd
                col0 = gi * G + di * H
                w_block = d["w_ih"][gate * H:(gate + 1) * H, :]         # (H, in)
                b_block = (d["b_ih"] + d["b_hh"])[gate * H:(gate + 1) * H]
                w_all = w_all.at[l, :layer_in, col0:col0 + H].set(w_block.T)
                b_all = b_all.at[l, 0, col0:col0 + H].set(b_block)
    w_all = w_all.astype(jnp.bfloat16)                 # bf16 MXU inputs

    fc_w_pad = jnp.zeros((G, c_pad), jnp.float32)
    fc_w_pad = fc_w_pad.at[:2 * H, :num_classes].set(jnp.transpose(fc_w))
    fc_w_pad = fc_w_pad.astype(jnp.bfloat16)
    fc_b_pad = jnp.zeros((1, c_pad), jnp.float32).at[0, :num_classes].set(fc_b)

    return {
        # original PyTorch-layout params (for the reference check)
        "torch_layers": torch_layers,
        "torch_fc_w": fc_w,
        "torch_fc_b": fc_b,
        # fused-kernel params
        "w_all": w_all,
        "b_all": b_all,
        "fc_w": fc_w_pad,
        "fc_b": fc_b_pad,
    }


# ----------------------------------------------------------------------------
# Plain-JAX f32 reference following PyTorch gate math exactly (sanity check).
# ----------------------------------------------------------------------------
def reference_forward(params, x, hidden_size):
    H = hidden_size
    layer_in = x
    for dirs in params["torch_layers"]:
        hs = []
        for d in dirs:
            gates = layer_in @ d["w_ih"].T + d["b_ih"] + d["b_hh"]  # h0 == 0
            i = jax.nn.sigmoid(gates[:, 0 * H:1 * H])
            f = jax.nn.sigmoid(gates[:, 1 * H:2 * H])
            g = jnp.tanh(gates[:, 2 * H:3 * H])
            o = jax.nn.sigmoid(gates[:, 3 * H:4 * H])
            c = f * jnp.zeros_like(i) + i * g                       # c0 == 0
            hs.append(o * jnp.tanh(c))
        layer_in = jnp.concatenate(hs, axis=-1)
    return layer_in @ params["torch_fc_w"].T + params["torch_fc_b"]


if __name__ == "__main__":
    batch = 2
    input_size = 16
    hidden_size = 32
    num_layers = 2
    num_classes = 4

    key = jax.random.PRNGKey(0)
    key, pkey, xkey = jax.random.split(key, 3)
    params = init_params(pkey, input_size, hidden_size, num_layers, num_classes)
    x = jax.random.normal(xkey, (batch, input_size), dtype=jnp.float32)

    forward = jax.jit(bilstm_classifier_forward, static_argnums=(2, 3))
    out = forward(params, x, hidden_size, num_classes)
    out = jax.block_until_ready(out)

    ref = reference_forward(params, x, hidden_size)
    assert out.shape == (batch, num_classes), out.shape
    # Kernel uses bf16 matmul inputs (f32 accumulation / gate math), so compare
    # against the f32 reference with a bf16-appropriate tolerance.
    assert jnp.allclose(out, ref, atol=3e-2, rtol=3e-2), (out, ref)

    print("KERNEL_OK")
</pallas_src>

<mosaic_0001>
module attributes {stable_mosaic.version = 11 : i64} {
  func.func @kernel(%arg0: i32, %arg1: memref<8x128xf32, #tpu.memory_space<vmem>>, %arg2: memref<2x128x384xbf16, #tpu.memory_space<vmem>>, %arg3: memref<2x1x384xf32, #tpu.memory_space<vmem>>, %arg4: memref<128x128xbf16, #tpu.memory_space<vmem>>, %arg5: memref<1x128xf32, #tpu.memory_space<vmem>>, %arg6: memref<8x128xf32, #tpu.memory_space<vmem>>) attributes {dimension_semantics = [#tpu.dimension_semantics<parallel>], iteration_bounds = array<i64: 1>, scalar_prefetch = 0 : i64, scratch_operands = 0 : i64, tpu.core_type = #tpu.core_type<tc>, window_params = [{transform_indices = @transform_0, window_bounds = array<i64: 8, 128>}, {pipeline_mode = #tpu.pipeline_mode<synchronous>, transform_indices = @transform_1, window_bounds = array<i64: 2, 128, 384>}, {pipeline_mode = #tpu.pipeline_mode<synchronous>, transform_indices = @transform_2, window_bounds = array<i64: 2, 1, 384>}, {pipeline_mode = #tpu.pipeline_mode<synchronous>, transform_indices = @transform_3, window_bounds = array<i64: 128, 128>}, {pipeline_mode = #tpu.pipeline_mode<synchronous>, transform_indices = @transform_4, window_bounds = array<i64: 1, 128>}, {transform_indices = @transform_5, window_bounds = array<i64: 8, 128>}]} {
    %c0 = arith.constant 0 : index
    %c0_0 = arith.constant 0 : index
    %0 = vector.load %arg1[%c0, %c0_0] : memref<8x128xf32, #tpu.memory_space<vmem>>, vector<8x128xf32>
    %1 = arith.truncf %0 : vector<8x128xf32> to vector<8x128xbf16>
    %c0_1 = arith.constant 0 : index
    %c0_2 = arith.constant 0 : index
    %c0_3 = arith.constant 0 : index
    %2 = vector.load %arg2[%c0_1, %c0_2, %c0_3] : memref<2x128x384xbf16, #tpu.memory_space<vmem>>, vector<1x128x384xbf16>
    %3 = vector.shape_cast %2 : vector<1x128x384xbf16> to vector<128x384xbf16>
    %cst = arith.constant dense<0.000000e+00> : vector<8x384xf32>
    %4 = tpu.matmul %1, %3, %cst {dimension_numbers = #tpu.dot_dimension_numbers<[1], [0], [0], [1], [0, 0, 1, 1], [], []>} : vector<8x128xbf16>, vector<128x384xbf16>, vector<8x384xf32> -> vector<8x384xf32>
    %c0_4 = arith.constant 0 : index
    %c0_5 = arith.constant 0 : index
    %c0_6 = arith.constant 0 : index
    %5 = vector.load %arg3[%c0_4, %c0_5, %c0_6] : memref<2x1x384xf32, #tpu.memory_space<vmem>>, vector<1x1x384xf32>
    %6 = vector.shape_cast %5 : vector<1x1x384xf32> to vector<1x384xf32>
    %7 = vector.broadcast %6 : vector<1x384xf32> to vector<8x384xf32>
    %8 = arith.addf %4, %7 : vector<8x384xf32>
    %9 = vector.extract_strided_slice %8 {offsets = [0, 0], sizes = [8, 128], strides = [1, 1]} : vector<8x384xf32> to vector<8x128xf32>
    %10 = arith.negf %9 : vector<8x128xf32>
    %11 = math.exp %10 : vector<8x128xf32>
    %cst_7 = arith.constant 1.000000e+00 : f32
    %12 = vector.broadcast %cst_7 : f32 to vector<8x128xf32>
    %13 = arith.addf %12, %11 : vector<8x128xf32>
    %14 = arith.divf %12, %13 : vector<8x128xf32>
    %15 = vector.extract_strided_slice %8 {offsets = [0, 128], sizes = [8, 128], strides = [1, 1]} : vector<8x384xf32> to vector<8x128xf32>
    %16 = math.tanh %15 : vector<8x128xf32>
    %17 = vector.extract_strided_slice %8 {offsets = [0, 256], sizes = [8, 128], strides = [1, 1]} : vector<8x384xf32> to vector<8x128xf32>
    %18 = arith.negf %17 : vector<8x128xf32>
    %19 = math.exp %18 : vector<8x128xf32>
    %cst_8 = arith.constant 1.000000e+00 : f32
    %20 = vector.broadcast %cst_8 : f32 to vector<8x128xf32>
    %21 = arith.addf %20, %19 : vector<8x128xf32>
    %22 = arith.divf %20, %21 : vector<8x128xf32>
    %23 = arith.mulf %14, %16 : vector<8x128xf32>
    %24 = math.tanh %23 : vector<8x128xf32>
    %25 = arith.mulf %22, %24 : vector<8x128xf32>
    %26 = arith.truncf %25 : vector<8x128xf32> to vector<8x128xbf16>
    %c1 = arith.constant 1 : index
    %c0_9 = arith.constant 0 : index
    %c0_10 = arith.constant 0 : index
    %27 = vector.load %arg2[%c1, %c0_9, %c0_10] : memref<2x128x384xbf16, #tpu.memory_space<vmem>>, vector<1x128x384xbf16>
    %28 = vector.shape_cast %27 : vector<1x128x384xbf16> to vector<128x384xbf16>
    %cst_11 = arith.constant dense<0.000000e+00> : vector<8x384xf32>
    %29 = tpu.matmul %26, %28, %cst_11 {dimension_numbers = #tpu.dot_dimension_numbers<[1], [0], [0], [1], [0, 0, 1, 1], [], []>} : vector<8x128xbf16>, vector<128x384xbf16>, vector<8x384xf32> -> vector<8x384xf32>
    %c1_12 = arith.constant 1 : index
    %c0_13 = arith.constant 0 : index
    %c0_14 = arith.constant 0 : index
    %30 = vector.load %arg3[%c1_12, %c0_13, %c0_14] : memref<2x1x384xf32, #tpu.memory_space<vmem>>, vector<1x1x384xf32>
    %31 = vector.shape_cast %30 : vector<1x1x384xf32> to vector<1x384xf32>
    %32 = vector.broadcast %31 : vector<1x384xf32> to vector<8x384xf32>
    %33 = arith.addf %29, %32 : vector<8x384xf32>
    %34 = vector.extract_strided_slice %33 {offsets = [0, 0], sizes = [8, 128], strides = [1, 1]} : vector<8x384xf32> to vector<8x128xf32>
    %35 = arith.negf %34 : vector<8x128xf32>
    %36 = math.exp %35 : vector<8x128xf32>
    %cst_15 = arith.constant 1.000000e+00 : f32
    %37 = vector.broadcast %cst_15 : f32 to vector<8x128xf32>
    %38 = arith.addf %37, %36 : vector<8x128xf32>
    %39 = arith.divf %37, %38 : vector<8x128xf32>
    %40 = vector.extract_strided_slice %33 {offsets = [0, 128], sizes = [8, 128], strides = [1, 1]} : vector<8x384xf32> to vector<8x128xf32>
    %41 = math.tanh %40 : vector<8x128xf32>
    %42 = vector.extract_strided_slice %33 {offsets = [0, 256], sizes = [8, 128], strides = [1, 1]} : vector<8x384xf32> to vector<8x128xf32>
    %43 = arith.negf %42 : vector<8x128xf32>
    %44 = math.exp %43 : vector<8x128xf32>
    %cst_16 = arith.constant 1.000000e+00 : f32
    %45 = vector.broadcast %cst_16 : f32 to vector<8x128xf32>
    %46 = arith.addf %45, %44 : vector<8x128xf32>
    %47 = arith.divf %45, %46 : vector<8x128xf32>
    %48 = arith.mulf %39, %41 : vector<8x128xf32>
    %49 = math.tanh %48 : vector<8x128xf32>
    %50 = arith.mulf %47, %49 : vector<8x128xf32>
    %51 = arith.truncf %50 : vector<8x128xf32> to vector<8x128xbf16>
    %c0_17 = arith.constant 0 : index
    %c0_18 = arith.constant 0 : index
    %52 = vector.load %arg4[%c0_17, %c0_18] : memref<128x128xbf16, #tpu.memory_space<vmem>>, vector<128x128xbf16>
    %cst_19 = arith.constant dense<0.000000e+00> : vector<8x128xf32>
    %53 = tpu.matmul %51, %52, %cst_19 {dimension_numbers = #tpu.dot_dimension_numbers<[1], [0], [0], [1], [0, 0, 1, 1], [], []>} : vector<8x128xbf16>, vector<128x128xbf16>, vector<8x128xf32> -> vector<8x128xf32>
    %c0_20 = arith.constant 0 : index
    %c0_21 = arith.constant 0 : index
    %54 = vector.load %arg5[%c0_20, %c0_21] : memref<1x128xf32, #tpu.memory_space<vmem>>, vector<1x128xf32>
    %55 = vector.broadcast %54 : vector<1x128xf32> to vector<8x128xf32>
    %56 = arith.addf %53, %55 : vector<8x128xf32>
    %c0_22 = arith.constant 0 : index
    %c0_23 = arith.constant 0 : index
    %57 = vector.load %arg6[%c0_22, %c0_23] : memref<8x128xf32, #tpu.memory_space<vmem>>, vector<8x128xf32>
    tpu.vector_store %arg6[%c0_22, %c0_23], %56 {strides = array<i32>} : memref<8x128xf32, #tpu.memory_space<vmem>>, vector<8x128xf32>,
    return
  }
  func.func @transform_0(%arg0: i32) -> (i32, i32) {
    %c0_i32 = arith.constant 0 : i32
    %c0_i32_0 = arith.constant 0 : i32
    return %arg0, %c0_i32 : i32, i32
  }
  func.func @transform_1(%arg0: i32) -> (i32, i32, i32) {
    %c0_i32 = arith.constant 0 : i32
    %c0_i32_0 = arith.constant 0 : i32
    %c0_i32_1 = arith.constant 0 : i32
    %c0_i32_2 = arith.constant 0 : i32
    return %c0_i32, %c0_i32_0, %c0_i32_1 : i32, i32, i32
  }
  func.func @transform_2(%arg0: i32) -> (i32, i32, i32) {
    %c0_i32 = arith.constant 0 : i32
    %c0_i32_0 = arith.constant 0 : i32
    %c0_i32_1 = arith.constant 0 : i32
    %c0_i32_2 = arith.constant 0 : i32
    return %c0_i32, %c0_i32_0, %c0_i32_1 : i32, i32, i32
  }
  func.func @transform_3(%arg0: i32) -> (i32, i32) {
    %c0_i32 = arith.constant 0 : i32
    %c0_i32_0 = arith.constant 0 : i32
    %c0_i32_1 = arith.constant 0 : i32
    return %c0_i32, %c0_i32_0 : i32, i32
  }
  func.func @transform_4(%arg0: i32) -> (i32, i32) {
    %c0_i32 = arith.constant 0 : i32
    %c0_i32_0 = arith.constant 0 : i32
    %c0_i32_1 = arith.constant 0 : i32
    return %c0_i32, %c0_i32_0 : i32, i32
  }
  func.func @transform_5(%arg0: i32) -> (i32, i32) {
    %c0_i32 = arith.constant 0 : i32
    %c0_i32_0 = arith.constant 0 : i32
    return %arg0, %c0_i32 : i32, i32
  }
}

</mosaic_0001>

<bundles_post_ra>
// kernel: bilstm_classifier_forward.1
= control target key start
LH: loop header
LB: loop body
LE: loop exit
PB: predicated region body
PF: predicated region fallthrough
CT: control target
= control target key end

     0   :  { %10 = vsyncpa [#allocation3], 0  ;;  %s1126_s0 = inlined_call_operand.vmem [shape: f32[8,128], index: 0, kind: input, shape index: {}]   ;;  %s1127_s1 = inlined_call_operand.hbm [shape: bf16[2,128,384], index: 1, kind: input, shape index: {}]   ;;  %s1128_s2 = inlined_call_operand.vmem [shape: f32[2,1,384], index: 2, kind: input, shape index: {}]   ;;  %s1129_s3 = inlined_call_operand.hbm [shape: bf16[128,128], index: 3, kind: input, shape index: {}]   ;;  %s1130_s4 = inlined_call_operand.vmem [shape: f32[1,128], index: 4, kind: input, shape index: {}]   ;;  %s1131_s5 = inlined_call_operand.vmem [shape: f32[8,128], index: 5, kind: output, shape index: {}]  }
   0x1   :  { %11 = vsyncpa [#allocation5], 0  ;;  %s1019_s18 = smov [#allocation2]  }
   0x2   :  { %s19_s19 = sshll.u32 %s1019_s18, 4  ;;  %s20_s19 = int_to_ptr.vmem [resolvable:$true] %s19_s19 }
   0x3   :  { %s983_s20 = scalar_lea.vmem %s20_s19, 6144  ;;  %p988_p1 = scmp.lt.s32.totalorder %s20_s19, %s20_s19 }
   0x4   :  { %p984_p0 = scmp.ne.s32.totalorder %s20_s19, %s983_s20  ;;  %p989_p2 = scmp.lt.s32.totalorder %s983_s20, %s983_s20 }
   0x6   :  { %p990_p3 = por %p989_p2, %p988_p1 }
   0x8   :  { %p991_p4 = pnand %p990_p3, %p984_p0 }
   0xa   :  { %994 = shalt.err (!%p991_p4)
}
   0xb   :  { %s1020_s21 = smov 192   ;;  %s1021_s22 = smov 12  }
   0xc   :  { %25 = dma.hbm_to_vmem [thread:$0]  %s1127_s1, 6144, %s20_s19, [#allocation3], %s1020_s21, %s1020_s21, %s1021_s22  }
   0xd   :  { %s1022_s25 = smov [#allocation4]  }
   0xe   :  { %s33_s26 = sshll.u32 %s1022_s25, 4  ;;  %s34_s26 = int_to_ptr.vmem [resolvable:$true] %s33_s26 }
   0xf   :  { %s1003_s27 = scalar_lea.vmem %s34_s26, 1024  ;;  %p1008_p6 = scmp.lt.s32.totalorder %s34_s26, %s34_s26 }
  0x10   :  { %p1004_p5 = scmp.ne.s32.totalorder %s34_s26, %s1003_s27  ;;  %p1009_p7 = scmp.lt.s32.totalorder %s1003_s27, %s1003_s27 }
  0x12   :  { %p1010_p8 = por %p1009_p7, %p1008_p6 }
  0x14   :  { %p1011_p9 = pnand %p1010_p8, %p1004_p5 }
  0x16   :  { %1014 = shalt.err (!%p1011_p9)
}
  0x17   :  { %s1023_s28 = smov 64   ;;  %s1024_s29 = smov 4  }
  0x18   :  { %39 = dma.hbm_to_vmem [thread:$0]  %s1129_s3, 1024, %s34_s26, [#allocation5], %s1023_s28, %s1023_s28, %s1024_s29  }
  0x19   :  { %1015 = dma.done.wait [#allocation3], 6144  }
  0x1a   :  { %1016 = vsyncadd [#allocation3], 4294961152 }
  0x1b   :  { %1017 = dma.done.wait [#allocation5], 1024  }
  0x1c   :  { %1018 = vsyncadd [#allocation5], 4294966272  ;;  %v1025_v0 = vmov 0.0   ;;  %v1026_v1 = vmov 0   ;;  %vm1027_vm0 = vmmov 0   ;;  %v49_v25 = vld [vmem:[%s1126_s0] sm:$0xff]  ;;  %v85_v52 = vlaneseq }
  0x1d   :  { %810 = vmatprep.subr.bf16.mxu1 %v1025_v0  ;;  %260 = vmatprep.mubr.bf16.mxu0 %v1026_v1  ;;  %v879_v2 = vld [vmem:[#allocation2 + $0xac] ss:$12 sps:$4 sm:$0xff]   ;;  %v881_v3 = vld [vmem:[#allocation2 + $0xa8] ss:$12 sps:$4 sm:$0xff]   ;;  %v884_v5 = vld [vmem:[#allocation2 + $0x90] ss:$12 sps:$4 sm:$0xff]   ;;  %v50_v27 = vpack.c.bf16 %v49_v25, %v49_v25 }
  0x1e   :  { %826 = vmatprep.mubr.msk.bf16.mxu1 %vm1027_vm0, %v1025_v0  ;;  %228 = vmatprep.subr.bf16.mxu0 %v879_v2  ;;  %v882_v4 = vld [vmem:[#allocation2 + $0x94] ss:$12 sps:$4 sm:$0xff]   ;;  %v885_v6 = vld [vmem:[#allocation2 + $0x7c] ss:$12 sps:$4 sm:$0xff]   ;;  %v887_v8 = vld [vmem:[#allocation2 + $0x78] ss:$12 sps:$4 sm:$0xff]  }
  0x1f   :  { %229 = vmatpush1.bf16.msra.mxu0 %v881_v3  ;;  %v888_v7 = vld [vmem:[#allocation2 + $0xb0] ss:$12 sps:$4 sm:$0xff]   ;;  %v892_v9 = vld [vmem:[#allocation2 + $0x98] ss:$12 sps:$4 sm:$0xff]   ;;  %v896_v11 = vld [vmem:[#allocation2 + $0x80] ss:$12 sps:$4 sm:$0xff]  }
  0x20   :  { %230 = vmatprep.subr.bf16.mxu0 %v882_v4  ;;  %811 = vmatpush3.bf16.msra.mxu1 %v888_v7  ;;  %v889_v10 = vld [vmem:[#allocation2 + $0x64] ss:$12 sps:$4 sm:$0xff]   ;;  %v891_v12 = vld [vmem:[#allocation2 + $0x60] ss:$12 sps:$4 sm:$0xff]   ;;  %v900_v14 = vld [vmem:[#allocation2 + $0x68] ss:$12 sps:$4 sm:$0xff]  }
  0x21   :  { %812 = vmatprep.subr.bf16.mxu1 %v1025_v0  ;;  %v893_v13 = vld [vmem:[#allocation2 + $0x4c] ss:$12 sps:$4 sm:$0xff]   ;;  %v895_v15 = vld [vmem:[#allocation2 + $0x48] ss:$12 sps:$4 sm:$0xff]   ;;  %v899_v17 = vld [vmem:[#allocation2 + $0x30] ss:$12 sps:$4 sm:$0xff]  }
  0x22   :  { %v897_v16 = vld [vmem:[#allocation2 + $0x34] ss:$12 sps:$4 sm:$0xff]   ;;  %v904_v18 = vld [vmem:[#allocation2 + $0x50] ss:$12 sps:$4 sm:$0xff]   ;;  %v908_v20 = vld [vmem:[#allocation2 + $0x38] ss:$12 sps:$4 sm:$0xff]  }
  0x23   :  { %231 = vmatpush1.bf16.msra.mxu0 %v884_v5  ;;  %v901_v19 = vld [vmem:[#allocation2 + $0x1c] ss:$12 sps:$4 sm:$0xff]   ;;  %v903_v21 = vld [vmem:[#allocation2 + $0x18] ss:$12 sps:$4 sm:$0xff]   ;;  %v909_v23 = vld [vmem:[#allocation2 + $0x20] ss:$12 sps:$4 sm:$0xff]  }
  0x24   :  { %232 = vmatprep.subr.bf16.mxu0 %v885_v6  ;;  %813 = vmatpush3.bf16.msra.mxu1 %v892_v9  ;;  %v905_v22 = vld [vmem:[#allocation2 + $0x4] ss:$12 sps:$4 sm:$0xff]   ;;  %v907_v24 = vld [vmem:[#allocation2] ss:$12 sps:$4 sm:$0xff]   ;;  %v910_v26 = vld [vmem:[#allocation2 + $0x8] ss:$12 sps:$4 sm:$0xff]  }
  0x25   :  { %814 = vmatprep.subr.bf16.mxu1 %v1025_v0  ;;  %v913_v28 = vld [vmem:[#allocation2 + $0x16c] ss:$12 sps:$4 sm:$0xff]   ;;  %v911_v29 = vld [vmem:[#allocation2 + $0x168] ss:$12 sps:$4 sm:$0xff]   ;;  %v914_v30 = vld [vmem:[#allocation2 + $0x170] ss:$12 sps:$4 sm:$0xff]  }
  0x26   :  { %v917_v31 = vld [vmem:[#allocation2 + $0x154] ss:$12 sps:$4 sm:$0xff]   ;;  %v915_v32 = vld [vmem:[#allocation2 + $0x150] ss:$12 sps:$4 sm:$0xff]   ;;  %v918_v33 = vld [vmem:[#allocation2 + $0x158] ss:$12 sps:$4 sm:$0xff]  }
  0x27   :  { %233 = vmatpush1.bf16.msra.mxu0 %v887_v8  ;;  %v921_v34 = vld [vmem:[#allocation2 + $0x13c] ss:$12 sps:$4 sm:$0xff]   ;;  %v919_v35 = vld [vmem:[#allocation2 + $0x138] ss:$12 sps:$4 sm:$0xff]   ;;  %v922_v36 = vld [vmem:[#allocation2 + $0x140] ss:$12 sps:$4 sm:$0xff]  }
  0x28   :  { %234 = vmatprep.subr.bf16.mxu0 %v889_v10  ;;  %815 = vmatpush3.bf16.msra.mxu1 %v896_v11  ;;  %v925_v37 = vld [vmem:[#allocation2 + $0x124] ss:$12 sps:$4 sm:$0xff]   ;;  %v923_v38 = vld [vmem:[#allocation2 + $0x120] ss:$12 sps:$4 sm:$0xff]   ;;  %v926_v39 = vld [vmem:[#allocation2 + $0x128] ss:$12 sps:$4 sm:$0xff]  }
  0x29   :  { %816 = vmatprep.subr.bf16.mxu1 %v1025_v0  ;;  %v927_v40 = vld [vmem:[#allocation2 + $0x108] ss:$12 sps:$4 sm:$0xff]   ;;  %v929_v41 = vld [vmem:[#allocation2 + $0x10c] ss:$12 sps:$4 sm:$0xff]   ;;  %v930_v42 = vld [vmem:[#allocation2 + $0x110] ss:$12 sps:$4 sm:$0xff]  }
  0x2a   :  { %v933_v43 = vld [vmem:[#allocation2 + $0xf4] ss:$12 sps:$4 sm:$0xff]   ;;  %v931_v44 = vld [vmem:[#allocation2 + $0xf0] ss:$12 sps:$4 sm:$0xff]   ;;  %v934_v45 = vld [vmem:[#allocation2 + $0xf8] ss:$12 sps:$4 sm:$0xff]  }
  0x2b   :  { %235 = vmatpush1.bf16.msra.mxu0 %v891_v12  ;;  %v937_v46 = vld [vmem:[#allocation2 + $0xdc] ss:$12 sps:$4 sm:$0xff]   ;;  %v935_v47 = vld [vmem:[#allocation2 + $0xd8] ss:$12 sps:$4 sm:$0xff]   ;;  %v938_v48 = vld [vmem:[#allocation2 + $0xe0] ss:$12 sps:$4 sm:$0xff]  }
  0x2c   :  { %236 = vmatprep.subr.bf16.mxu0 %v893_v13  ;;  %817 = vmatpush3.bf16.msra.mxu1 %v900_v14  ;;  %v941_v49 = vld [vmem:[#allocation2 + $0xc4] ss:$12 sps:$4 sm:$0xff]   ;;  %v939_v50 = vld [vmem:[#allocation2 + $0xc0] ss:$12 sps:$4 sm:$0xff]   ;;  %v942_v51 = vld [vmem:[#allocation2 + $0xc8] ss:$12 sps:$4 sm:$0xff]  }
  0x2d   :  { %818 = vmatprep.subr.bf16.mxu1 %v1025_v0  ;;  %v1088_v53 = vshrl.u32 %v85_v52, 7  ;;  %v83_v55 = vld [vmem:[%s1128_s2] sm:$0x7] }
  0x2e   :  { %v946_v25 = vld [vmem:[#allocation4 + $0x20] sm:$0xff]  }
  0x2f   :  { %237 = vmatpush1.bf16.msra.mxu0 %v895_v15  ;;  %v87_v54 = vsub.s32 0, %v1088_v53  ;;  %v95_v57 = vsub.s32 2, %v1088_v53  ;;  %v91_v6 = vsub.s32 1, %v1088_v53  ;;  %v774_v53 = vld [vmem:[%s1130_s4] ss:$0 sm:$0xff] }
  0x30   :  { %238 = vmatprep.subr.bf16.mxu0 %v897_v16  ;;  %819 = vmatpush3.bf16.msra.mxu1 %v904_v18 }
  0x31   :  { %820 = vmatprep.subr.bf16.mxu1 %v1025_v0  ;;  %v88_v56 = vrot.slane %v83_v55, %v87_v54  ;;  %v96_v62 = vrot.slane %v83_v55, %v95_v57  ;;  %v92_v9 = vrot.slane %v83_v55, %v91_v6 }
  0x33   :  { %239 = vmatpush1.bf16.msra.mxu0 %v899_v17 }
  0x34   :  { %240 = vmatprep.subr.bf16.mxu0 %v901_v19  ;;  %821 = vmatpush3.bf16.msra.mxu1 %v908_v20 }
  0x35   :  { %822 = vmatprep.subr.bf16.mxu1 %v1025_v0 }
  0x37   :  { %241 = vmatpush1.bf16.msra.mxu0 %v903_v21 }
  0x38   :  { %242 = vmatprep.subr.bf16.mxu0 %v905_v22  ;;  %823 = vmatpush3.bf16.msra.mxu1 %v909_v23  ;;  %v943_v22 = vld [vmem:[#allocation4 + $0x38] sm:$0xff]   ;;  %v944_v23 = vld [vmem:[#allocation4 + $0x30] sm:$0xff]  }
  0x39   :  { %824 = vmatprep.subr.bf16.mxu1 %v1025_v0 }
  0x3b   :  { %243 = vmatpush1.bf16.msra.mxu0 %v907_v24  ;;  %v945_v24 = vld [vmem:[#allocation4 + $0x28] sm:$0xff]  }
  0x3c   :  { %825 = vmatpush3.bf16.msra.mxu1 %v910_v26  ;;  %505 = vmatprep.subr.bf16.mxu0 %v913_v28  ;;  %v947_v26 = vld [vmem:[#allocation4 + $0x18] sm:$0xff]   ;;  %v949_v28 = vld [vmem:[#allocation4 + $0x8] sm:$0xff]  }
  0x3d   :  { %830 = vmatprep.subr.bf16.mxu1 %v1025_v0 }
  0x3e   :  { %261 = vmatmul.mubr.bf16.vlgmr.msra.gmra.mxu0 %v50_v27 }
  0x3f   :  { %537 = vmatprep.mubr.bf16.mxu0 %v1026_v1  ;;  %827 = vmatmul.mubr.bf16.vlgmr.msra.gmra.mxu1 %v50_v27  ;;  %v948_v27 = vld [vmem:[#allocation4 + $0x10] sm:$0xff]  }
  0x40   :  { %846 = vmatprep.mubr.msk.bf16.mxu1 %vm1027_vm0, %v1025_v0  ;;  %506 = vmatpush1.bf16.msra.mxu0 %v911_v29  ;;  %v950_v29 = vld [vmem:[#allocation4] sm:$0xff]  }
  0x41   :  { %831 = vmatpush3.bf16.msra.mxu1 %v914_v30  ;;  %507 = vmatprep.subr.bf16.mxu0 %v917_v31  ;;  %v747_v30 = vld [vmem:[%s1128_s2 + $0x3] sm:$0x7] }
  0x42   :  { %832 = vmatprep.subr.bf16.mxu1 %v1025_v0  ;;  %v365_v31 = vrot.slane %v747_v30, %v87_v54 }
  0x44   :  { %508 = vmatpush1.bf16.msra.mxu0 %v915_v32 }
  0x45   :  { %833 = vmatpush3.bf16.msra.mxu1 %v918_v33  ;;  %509 = vmatprep.subr.bf16.mxu0 %v921_v34 }
  0x46   :  { %834 = vmatprep.subr.bf16.mxu1 %v1025_v0 }
  0x48   :  { %510 = vmatpush1.bf16.msra.mxu0 %v919_v35 }
  0x49   :  { %835 = vmatpush3.bf16.msra.mxu1 %v922_v36  ;;  %511 = vmatprep.subr.bf16.mxu0 %v925_v37 }
  0x4a   :  { %836 = vmatprep.subr.bf16.mxu1 %v1025_v0 }
  0x4c   :  { %512 = vmatpush1.bf16.msra.mxu0 %v923_v38  ;;  %v373_v38 = vrot.slane %v747_v30, %v95_v57 }
  0x4d   :  { %837 = vmatpush3.bf16.msra.mxu1 %v926_v39  ;;  %513 = vmatprep.subr.bf16.mxu0 %v929_v41 }
  0x4e   :  { %838 = vmatprep.subr.bf16.mxu1 %v1025_v0 }
  0x50   :  { %514 = vmatpush1.bf16.msra.mxu0 %v927_v40 }
  0x51   :  { %839 = vmatpush3.bf16.msra.mxu1 %v930_v42  ;;  %515 = vmatprep.subr.bf16.mxu0 %v933_v43 }
  0x52   :  { %840 = vmatprep.subr.bf16.mxu1 %v1025_v0 }
  0x54   :  { %516 = vmatpush1.bf16.msra.mxu0 %v931_v44  ;;  %v369_v44 = vrot.slane %v747_v30, %v91_v6 }
  0x55   :  { %841 = vmatpush3.bf16.msra.mxu1 %v934_v45  ;;  %517 = vmatprep.subr.bf16.mxu0 %v937_v46 }
  0x56   :  { %842 = vmatprep.subr.bf16.mxu1 %v1025_v0 }
  0x58   :  { %518 = vmatpush1.bf16.msra.mxu0 %v935_v47 }
  0x59   :  { %843 = vmatpush3.bf16.msra.mxu1 %v938_v48  ;;  %519 = vmatprep.subr.bf16.mxu0 %v941_v49 }
  0x5a   :  { %844 = vmatprep.subr.bf16.mxu1 %v1025_v0 }
  0x5c   :  { %520 = vmatpush1.bf16.msra.mxu0 %v939_v50 }
  0x5d   :  { %845 = vmatpush3.bf16.msra.mxu1 %v942_v51  ;;  %850 = vmatprep.subr.bf16.mxu0 %v1025_v0 }
  0xfe   :  { %v262_v58 = vpop.f32.mrf.mxu0 }
  0xff   :  { %v263_v59 = vadd.f32 %v262_v58, %v88_v56  ;;  %v303_v63 = vpop.f32.mrf.mxu1 }
 0x100   :  { %v264_v60 = vpop.f32.mrf.mxu0  ;;  %v304_v4 = vadd.f32 %v303_v63, %v96_v62 }
 0x101   :  { %v745_v61 = vmul.f32 -1.442695, %v263_v59  ;;  %v828_v2 = vpop.f32.mrf.mxu1  ;;  %v265_v10 = vadd.f32 %v264_v60, %v92_v9 }
 0x102   :  { %v266_v1 = vpop.f32.mrf.mxu0  ;;  %v746_v8 = vmul.f32 -1.442695, %v304_v4 }
 0x103   :  { %951 = vpow2.f32 %v745_v61  ;;  %v306_v5 = vpop.f32.mrf.mxu1 }
 0x104   :  { %v267_v3 = vpop.f32.mrf.mxu0  ;;  %953 = vpow2.f32 %v746_v8 }
 0x105   :  { %v829_v7 = vpop.f32.mrf.mxu1  ;;  %955 = vtanh.f32 %v265_v10 }
 0x110   :  { %v952_v11 = vpop.eup %951 }
 0x111   :  { %v312_v12 = vadd.f32 1.0, %v952_v11  ;;  %v954_v13 = vpop.eup %953 }
 0x112   :  { %v319_v14 = vadd.f32 1.0, %v954_v13  ;;  %v956_v15 = vpop.eup %955 }
 0x113   :  { %957 = vrcp.f32 %v312_v12 }
 0x114   :  { %959 = vrcp.f32 %v319_v14 }
 0x120   :  { %v958_v16 = vpop.eup %957 }
 0x121   :  { %v322_v17 = vmul.f32 %v958_v16, %v956_v15  ;;  %v960_v18 = vpop.eup %959 }
 0x123   :  { %961 = vtanh.f32 %v322_v17 }
 0x130   :  { %v962_v19 = vpop.eup %961 }
 0x131   :  { %v324_v20 = vmul.f32 %v962_v19, %v960_v18 }
 0x133   :  { %v325_v21 = vpack.c.bf16 %v324_v20, %v324_v20 }
 0x135   :  { %538 = vmatmul.mubr.bf16.vlgmr.msra.gmra.mxu0 %v325_v21  ;;  %847 = vmatmul.mubr.bf16.vlgmr.msra.gmra.mxu1 %v325_v21 }
 0x136   :  { %866 = vmatprep.mubr.msk.bf16.mxu0 %vm1027_vm0, %v1025_v0  ;;  %851 = vmatpush3.bf16.msra.mxu0 %v943_v22 }
 0x137   :  { %852 = vmatprep.subr.bf16.mxu0 %v1025_v0 }
 0x13a   :  { %853 = vmatpush3.bf16.msra.mxu0 %v944_v23 }
 0x13b   :  { %854 = vmatprep.subr.bf16.mxu0 %v1025_v0 }
 0x13e   :  { %855 = vmatpush3.bf16.msra.mxu0 %v945_v24 }
 0x13f   :  { %856 = vmatprep.subr.bf16.mxu0 %v1025_v0 }
 0x142   :  { %857 = vmatpush3.bf16.msra.mxu0 %v946_v25 }
 0x143   :  { %858 = vmatprep.subr.bf16.mxu0 %v1025_v0 }
 0x146   :  { %859 = vmatpush3.bf16.msra.mxu0 %v947_v26 }
 0x147   :  { %860 = vmatprep.subr.bf16.mxu0 %v1025_v0 }
 0x14a   :  { %861 = vmatpush3.bf16.msra.mxu0 %v948_v27 }
 0x14b   :  { %862 = vmatprep.subr.bf16.mxu0 %v1025_v0 }
 0x14e   :  { %863 = vmatpush3.bf16.msra.mxu0 %v949_v28 }
 0x14f   :  { %864 = vmatprep.subr.bf16.mxu0 %v1025_v0 }
 0x152   :  { %865 = vmatpush3.bf16.msra.mxu0 %v950_v29 }
 0x1f5   :  { %v539_v32 = vpop.f32.mrf.mxu0  ;;  %v580_v33 = vpop.f32.mrf.mxu1 }
 0x1f6   :  { %v540_v34 = vadd.f32 %v539_v32, %v365_v31  ;;  %v581_v42 = vadd.f32 %v580_v33, %v373_v38 }
 0x1f7   :  { %v541_v35 = vpop.f32.mrf.mxu0  ;;  %v848_v36 = vpop.f32.mrf.mxu1 }
 0x1f8   :  { %v772_v37 = vmul.f32 -1.442695, %v540_v34  ;;  %v773_v43 = vmul.f32 -1.442695, %v581_v42  ;;  %v542_v45 = vadd.f32 %v541_v35, %v369_v44 }
 0x1f9   :  { %v543_v39 = vpop.f32.mrf.mxu0  ;;  %v583_v40 = vpop.f32.mrf.mxu1 }
 0x1fa   :  { %963 = vpow2.f32 %v772_v37 }
 0x1fb   :  { %v544_v0 = vpop.f32.mrf.mxu0  ;;  %v849_v41 = vpop.f32.mrf.mxu1  ;;  %965 = vpow2.f32 %v773_v43 }
 0x1fc   :  { %967 = vtanh.f32 %v542_v45 }
 0x207   :  { %v964_v46 = vpop.eup %963 }
 0x208   :  { %v589_v47 = vadd.f32 1.0, %v964_v46  ;;  %v966_v48 = vpop.eup %965 }
 0x209   :  { %v596_v49 = vadd.f32 1.0, %v966_v48  ;;  %v968_v50 = vpop.eup %967 }
 0x20a   :  { %969 = vrcp.f32 %v589_v47 }
 0x20b   :  { %971 = vrcp.f32 %v596_v49 }
 0x217   :  { %v970_v51 = vpop.eup %969 }
 0x218   :  { %v599_v52 = vmul.f32 %v970_v51, %v968_v50  ;;  %v972_v54 = vpop.eup %971 }
 0x21a   :  { %973 = vtanh.f32 %v599_v52 }
 0x227   :  { %v974_v55 = vpop.eup %973 }
 0x228   :  { %v601_v56 = vmul.f32 %v974_v55, %v972_v54 }
 0x22a   :  { %v602_v57 = vpack.c.bf16 %v601_v56, %v601_v56 }
 0x22c   :  { %867 = vmatmul.mubr.bf16.vlgmr.msra.gmra.mxu0 %v602_v57 }
 0x2ec   :  { %v708_v58 = vpop.f32.mrf.mxu0 }
 0x2ed   :  { %v709_v59 = vadd.f32 %v774_v53, %v708_v58 }
 0x2ee   :  { %v868_v60 = vpop.f32.mrf.mxu0 }
 0x2ef   :  { %714 = vst [vmem:[%s1131_s5] sm:$0xff] %v709_v59 }
 0x2f0   :  { %v711_v61 = vpop.f32.mrf.mxu0 }
 0x2f2   :  { %v869_v62 = vpop.f32.mrf.mxu0 }
 0x2f3   :  { %719 = vsyncpa [#allocation3], 1 }
 0x2f4   :  { %720 = vsyncpa [#allocation5], 1 }

</bundles_post_ra>
